<compile_context>
chip_gen: v6e
topology: v6e:2x2x1
jax: 0.10.0
libtpu: 0.0.40
codegen_flags: <defaults>
</compile_context>

<pallas_src>
import jax
import jax.numpy as jnp
from jax import lax
from jax.experimental import pallas as pl
from jax.experimental.pallas import tpu as pltpu

# ----------------------------- configuration --------------------------------
B = 8            # batch of decoded samples per env step (== sublane count)
A_DIM = 16       # action / latent dimension fed to the decoder
HID = 32         # decoder hidden width
N_DISC = 2       # number of discrete features
K_CAT = 4        # categories per discrete feature
N_CONT = 3       # number of continuous features
N_BIN = 3        # number of binary features
N_FEAT = N_DISC + N_CONT + N_BIN            # 8
HEAD_OUT = N_DISC * K_CAT + N_CONT + N_BIN  # 14 (fused decoder heads)
N_CLASSES = 4    # classifierA / classifierB output classes
CLS_OUT = 2 * N_CLASSES                     # 8 (fused classifiers)
EPS = 1e-7
DEFAULT_CHUNK = 128                         # env steps folded into one grid iter


# ------------------------------- the kernel ---------------------------------
def _env_kernel(action_ref,      # (TC, B, A_DIM)   streamed per chunk
                w1_ref,          # (A_DIM, HID)     resident
                b1_ref,          # (1, HID)         resident
                wh_ref,          # (HID, HEAD_OUT)  resident (fused decoder heads)
                bh_ref,          # (1, HEAD_OUT)    resident
                wc_ref,          # (N_FEAT, CLS_OUT) resident (fused classifiers)
                bc_ref,          # (1, CLS_OUT)     resident
                decoded_ref,     # (TC, B, N_FEAT)  per chunk
                reward_ref):     # (TC, 1, 1)       per chunk
    tc = action_ref.shape[0]
    rows = tc * B

    # (TC, B, A_DIM) -> (TC*B, A_DIM): B == 8 sublanes, so this is layout-free.
    act = action_ref[...].reshape(rows, A_DIM)

    # ---- decoder trunk (no_grad in reference; forward pass only) ------------
    h = jnp.maximum(
        jnp.dot(act, w1_ref[...], preferred_element_type=jnp.float32)
        + b1_ref[...],
        0.0)                                                   # (rows, HID)

    # ---- all three decoder heads in a single fused matmul -------------------
    head_out = (jnp.dot(h, wh_ref[...], preferred_element_type=jnp.float32)
                + bh_ref[...])                                 # (rows, HEAD_OUT)

    # discrete features: first-match argmax over each K_CAT group (== torch.argmax)
    pieces = []
    for f in range(N_DISC):                                    # static, 2 iterations
        lg = head_out[:, f * K_CAT:(f + 1) * K_CAT]            # (rows, K)
        mx = jnp.max(lg, axis=-1, keepdims=True)
        iota = lax.broadcasted_iota(jnp.int32, lg.shape, 1)
        idx = jnp.min(jnp.where(lg == mx, iota, K_CAT), axis=-1, keepdims=True)
        pieces.append(idx.astype(jnp.float32))                 # (rows, 1)

    # continuous (raw) + binary (sigmoid>0.5 <=> logit>0), contiguous columns
    cb = head_out[:, N_DISC * K_CAT:]                          # (rows, N_CONT+N_BIN)
    ci = lax.broadcasted_iota(jnp.int32, cb.shape, 1)
    cb = jnp.where(ci < N_CONT, cb, (cb > 0.0).astype(jnp.float32))
    pieces.append(cb)

    decoded = jnp.concatenate(pieces, axis=1)                  # (rows, N_FEAT)

    # ---- single store of the whole chunk's decoded features -----------------
    decoded3 = decoded.reshape(tc, B, N_FEAT)                  # layout-free (B==8)
    decoded_ref[...] = decoded3

    # ---- per-step column-wise min/max normalisation over the batch (dim=0) --
    dmin = jnp.min(decoded3, axis=1, keepdims=True)            # (tc, 1, F)
    dmax = jnp.max(decoded3, axis=1, keepdims=True)
    dn = ((decoded3 - dmin) / (dmax - dmin + EPS)).reshape(rows, N_FEAT)

    # ---- both classifiers in a single fused matmul ---------------------------
    logits = (jnp.dot(dn, wc_ref[...], preferred_element_type=jnp.float32)
              + bc_ref[...])                                   # (rows, 2*N_CLASSES)
    logits3 = logits.reshape(tc, B, CLS_OUT)

    # CE(logits, argmax(logits)) with mean reduction over the step's batch
    #   == mean_b( logsumexp(logits_b) - max(logits_b) )
    def self_ce(lg):                                           # (tc, B, C) -> (tc, 1, 1)
        m = jnp.max(lg, axis=-1, keepdims=True)
        lse = m + jnp.log(jnp.sum(jnp.exp(lg - m), axis=-1, keepdims=True))
        return jnp.mean(lse - m, axis=1, keepdims=True)

    rew = (0.4 * self_ce(logits3[:, :, :N_CLASSES])
           + 0.4 * self_ce(logits3[:, :, N_CLASSES:]))         # (tc, 1, 1)
    reward_ref[...] = rew


# ------------------------------- wrappers ------------------------------------
def env_forward_steps(actions, params, *, chunk=DEFAULT_CHUNK):
    """Batched env steps: actions (T, B, A_DIM) -> (decoded (T,B,F), rewards (T,)).

    Each grid iteration processes `chunk` env steps (matmuls batched over
    chunk*B rows).  Weights/biases are VMEM-resident across the whole grid
    (constant index maps); only actions / decoded / rewards stream per chunk.
    The chunk axis is 'parallel' so a v7x megacore splits chunks across its
    two TensorCores.
    """
    w1, b1, wh, bh, wc, bc = params
    T = actions.shape[0]
    tc = max(1, min(chunk, T))
    nc = pl.cdiv(T, tc)
    t_pad = nc * tc
    if t_pad != T:
        actions = jnp.pad(actions, ((0, t_pad - T), (0, 0), (0, 0)))

    n_param = w1.size + b1.size + wh.size + bh.size + wc.size + bc.size
    cost = pl.CostEstimate(
        flops=2 * t_pad * B * (A_DIM * HID + HID * HEAD_OUT + N_FEAT * CLS_OUT),
        transcendentals=t_pad * B * (CLS_OUT + 2),
        bytes_accessed=4 * (t_pad * B * A_DIM + t_pad * B * N_FEAT + t_pad + n_param),
    )

    decoded, rewards = pl.pallas_call(
        _env_kernel,
        out_shape=(
            jax.ShapeDtypeStruct((t_pad, B, N_FEAT), jnp.float32),
            jax.ShapeDtypeStruct((t_pad, 1, 1), jnp.float32),
        ),
        grid_spec=pltpu.PrefetchScalarGridSpec(
            num_scalar_prefetch=0,
            grid=(nc,),
            in_specs=[
                pl.BlockSpec((tc, B, A_DIM), lambda c: (c, 0, 0)),   # streamed
                pl.BlockSpec(w1.shape, lambda c: (0, 0)),            # resident
                pl.BlockSpec(b1.shape, lambda c: (0, 0)),            # resident
                pl.BlockSpec(wh.shape, lambda c: (0, 0)),            # resident
                pl.BlockSpec(bh.shape, lambda c: (0, 0)),            # resident
                pl.BlockSpec(wc.shape, lambda c: (0, 0)),            # resident
                pl.BlockSpec(bc.shape, lambda c: (0, 0)),            # resident
            ],
            out_specs=(
                pl.BlockSpec((tc, B, N_FEAT), lambda c: (c, 0, 0)),
                pl.BlockSpec((tc, 1, 1), lambda c: (c, 0, 0)),
            ),
        ),
        compiler_params=pltpu.CompilerParams(
            dimension_semantics=("parallel",)),
        cost_estimate=cost,
    )(actions, w1, b1, wh, bh, wc, bc)

    return decoded[:T], rewards[:T, 0, 0]


def env_forward(action, episode_target, params):
    """Mirrors Env.forward(action, episode_target) -> (next_states, reward, done).

    NOTE: a single env step (~20 KFLOPs) is launch-overhead dominated on every
    TPU generation; prefer env_forward_steps for rollouts (large T).
    """
    del episode_target  # cast to int64 in the reference but never used
    decoded, rewards = env_forward_steps(action[None], params, chunk=1)
    return decoded[0], rewards[0], True


# --------------------------- parameter construction --------------------------
def make_params(key):
    ks = jax.random.split(key, 8)

    def lin(kw, fan_in, fan_out):
        return jax.random.normal(kw, (fan_in, fan_out), jnp.float32) / jnp.sqrt(fan_in)

    # individual layers (as in the PyTorch modules) ...
    w1 = lin(ks[0], A_DIM, HID)
    b1 = jnp.zeros((1, HID), jnp.float32)
    wd = lin(ks[1], HID, N_DISC * K_CAT)
    bd = jnp.zeros((1, N_DISC * K_CAT), jnp.float32)
    wcont = lin(ks[2], HID, N_CONT)
    bcont = jnp.zeros((1, N_CONT), jnp.float32)
    wbin = lin(ks[3], HID, N_BIN)
    bbin = jnp.zeros((1, N_BIN), jnp.float32)
    wa = lin(ks[4], N_FEAT, N_CLASSES)
    ba = 0.01 * jax.random.normal(ks[5], (1, N_CLASSES), jnp.float32)
    wb = lin(ks[6], N_FEAT, N_CLASSES)
    bb = 0.01 * jax.random.normal(ks[7], (1, N_CLASSES), jnp.float32)

    # ... fused column-wise (heads / classifiers), weights & biases kept
    # separate so every resident input is sublane-aligned (16/32/8/1 rows).
    w_heads = jnp.concatenate([wd, wcont, wbin], axis=1)       # (HID, 14)
    b_heads = jnp.concatenate([bd, bcont, bbin], axis=1)       # (1, 14)
    w_cls = jnp.concatenate([wa, wb], axis=1)                  # (N_FEAT, 8)
    b_cls = jnp.concatenate([ba, bb], axis=1)                  # (1, 8)
    return (w1, b1, w_heads, b_heads, w_cls, b_cls)


# ---------------------------------- main --------------------------------------
if __name__ == "__main__":
    key = jax.random.PRNGKey(0)
    k_act, k_tgt, k_par, k_seq = jax.random.split(key, 4)

    action = jax.random.normal(k_act, (B, A_DIM), jnp.float32)
    episode_target = jax.random.randint(k_tgt, (B,), 0, N_CLASSES)  # unused, as in reference
    params = make_params(k_par)

    # single env step (matches Env.forward)
    next_states, reward, done = env_forward(action, episode_target, params)
    jax.block_until_ready((next_states, reward))
    assert next_states.shape == (B, N_FEAT) and next_states.dtype == jnp.float32
    assert reward.shape == ()
    assert bool(done) is True
    assert bool(jnp.isfinite(reward))

    # batched multi-step rollout: chunked grid, weights resident across the grid,
    # 2 chunks so a v7x megacore keeps both TensorCores busy.
    T = 256
    actions = jax.random.normal(k_seq, (T, B, A_DIM), jnp.float32)
    dec_steps, rew_steps = env_forward_steps(actions, params, chunk=128)
    jax.block_until_ready((dec_steps, rew_steps))
    assert dec_steps.shape == (T, B, N_FEAT)
    assert rew_steps.shape == (T,)
    assert bool(jnp.all(jnp.isfinite(rew_steps)))

    # consistency: step 0 of the chunked call matches a single-step call
    d0, r0, _ = env_forward(actions[0], episode_target, params)
    assert bool(jnp.allclose(d0, dec_steps[0], atol=1e-5))
    assert bool(jnp.allclose(r0, rew_steps[0], atol=1e-5))

    # padding path: T not divisible by the chunk size
    dec_p, rew_p = env_forward_steps(actions[:10], params, chunk=4)
    jax.block_until_ready((dec_p, rew_p))
    assert dec_p.shape == (10, B, N_FEAT) and rew_p.shape == (10,)
    assert bool(jnp.allclose(rew_p[:10], rew_steps[:10], atol=1e-5))

    print("KERNEL_OK")
</pallas_src>

<mosaic_0001>
module attributes {stable_mosaic.version = 11 : i64} {
  func.func @_env_kernel(%arg0: i32, %arg1: memref<1x8x16xf32, #tpu.memory_space<vmem>>, %arg2: memref<16x32xf32, #tpu.memory_space<vmem>>, %arg3: memref<1x32xf32, #tpu.memory_space<vmem>>, %arg4: memref<32x14xf32, #tpu.memory_space<vmem>>, %arg5: memref<1x14xf32, #tpu.memory_space<vmem>>, %arg6: memref<8x8xf32, #tpu.memory_space<vmem>>, %arg7: memref<1x8xf32, #tpu.memory_space<vmem>>, %arg8: memref<1x8x8xf32, #tpu.memory_space<vmem>>, %arg9: memref<1x1x1xf32, #tpu.memory_space<vmem>>) attributes {dimension_semantics = [#tpu.dimension_semantics<parallel>], iteration_bounds = array<i64: 1>, scalar_prefetch = 0 : i64, scratch_operands = 0 : i64, tpu.core_type = #tpu.core_type<tc>, window_params = [{transform_indices = @transform_0, window_bounds = array<i64: 1, 8, 16>}, {pipeline_mode = #tpu.pipeline_mode<synchronous>, transform_indices = @transform_1, window_bounds = array<i64: 16, 32>}, {pipeline_mode = #tpu.pipeline_mode<synchronous>, transform_indices = @transform_2, window_bounds = array<i64: 1, 32>}, {pipeline_mode = #tpu.pipeline_mode<synchronous>, transform_indices = @transform_3, window_bounds = array<i64: 32, 14>}, {pipeline_mode = #tpu.pipeline_mode<synchronous>, transform_indices = @transform_4, window_bounds = array<i64: 1, 14>}, {pipeline_mode = #tpu.pipeline_mode<synchronous>, transform_indices = @transform_5, window_bounds = array<i64: 8, 8>}, {pipeline_mode = #tpu.pipeline_mode<synchronous>, transform_indices = @transform_6, window_bounds = array<i64: 1, 8>}, {transform_indices = @transform_7, window_bounds = array<i64: 1, 8, 8>}, {transform_indices = @transform_8, window_bounds = array<i64: 1, 1, 1>}]} {
    %c0 = arith.constant 0 : index
    %c0_0 = arith.constant 0 : index
    %c0_1 = arith.constant 0 : index
    %0 = vector.load %arg1[%c0, %c0_0, %c0_1] : memref<1x8x16xf32, #tpu.memory_space<vmem>>, vector<1x8x16xf32>
    %1 = vector.shape_cast %0 : vector<1x8x16xf32> to vector<8x16xf32>
    %c0_2 = arith.constant 0 : index
    %c0_3 = arith.constant 0 : index
    %2 = vector.load %arg2[%c0_2, %c0_3] : memref<16x32xf32, #tpu.memory_space<vmem>>, vector<16x32xf32>
    %cst = arith.constant dense<0.000000e+00> : vector<8x32xf32>
    %3 = tpu.matmul %1, %2, %cst {dimension_numbers = #tpu.dot_dimension_numbers<[1], [0], [0], [1], [0, 0, 1, 1], [], []>} : vector<8x16xf32>, vector<16x32xf32>, vector<8x32xf32> -> vector<8x32xf32>
    %c0_4 = arith.constant 0 : index
    %c0_5 = arith.constant 0 : index
    %4 = vector.load %arg3[%c0_4, %c0_5] : memref<1x32xf32, #tpu.memory_space<vmem>>, vector<1x32xf32>
    %5 = vector.broadcast %4 : vector<1x32xf32> to vector<8x32xf32>
    %6 = arith.addf %3, %5 : vector<8x32xf32>
    %cst_6 = arith.constant 0.000000e+00 : f32
    %7 = vector.broadcast %cst_6 : f32 to vector<8x32xf32>
    %8 = arith.maximumf %6, %7 : vector<8x32xf32>
    %c0_7 = arith.constant 0 : index
    %c0_8 = arith.constant 0 : index
    %9 = vector.load %arg4[%c0_7, %c0_8] : memref<32x14xf32, #tpu.memory_space<vmem>>, vector<32x14xf32>
    %cst_9 = arith.constant dense<0.000000e+00> : vector<8x14xf32>
    %10 = tpu.matmul %8, %9, %cst_9 {dimension_numbers = #tpu.dot_dimension_numbers<[1], [0], [0], [1], [0, 0, 1, 1], [], []>} : vector<8x32xf32>, vector<32x14xf32>, vector<8x14xf32> -> vector<8x14xf32>
    %c0_10 = arith.constant 0 : index
    %c0_11 = arith.constant 0 : index
    %11 = vector.load %arg5[%c0_10, %c0_11] : memref<1x14xf32, #tpu.memory_space<vmem>>, vector<1x14xf32>
    %12 = vector.broadcast %11 : vector<1x14xf32> to vector<8x14xf32>
    %13 = arith.addf %10, %12 : vector<8x14xf32>
    %14 = vector.extract_strided_slice %13 {offsets = [0, 0], sizes = [8, 4], strides = [1, 1]} : vector<8x14xf32> to vector<8x4xf32>
    %cst_12 = arith.constant dense<0xFF800000> : vector<8xf32>
    %15 = vector.multi_reduction <maximumf>, %14, %cst_12 [1] : vector<8x4xf32> to vector<8xf32>
    %16 = vector.shape_cast %15 : vector<8xf32> to vector<8x1xf32>
    %17 = tpu.iota {dimensions = array<i32: 1>} : vector<8x4xi32>
    %18 = vector.broadcast %16 : vector<8x1xf32> to vector<8x4xf32>
    %19 = arith.cmpf oeq, %14, %18 : vector<8x4xf32>
    %c4_i32 = arith.constant 4 : i32
    %20 = vector.broadcast %c4_i32 : i32 to vector<8x4xi32>
    %21 = arith.select %19, %17, %20 : vector<8x4xi1>, vector<8x4xi32>
    %cst_13 = arith.constant dense<2147483647> : vector<8xi32>
    %22 = vector.multi_reduction <minsi>, %21, %cst_13 [1] : vector<8x4xi32> to vector<8xi32>
    %23 = vector.shape_cast %22 : vector<8xi32> to vector<8x1xi32>
    %24 = arith.sitofp %23 : vector<8x1xi32> to vector<8x1xf32>
    %25 = vector.extract_strided_slice %13 {offsets = [0, 4], sizes = [8, 4], strides = [1, 1]} : vector<8x14xf32> to vector<8x4xf32>
    %cst_14 = arith.constant dense<0xFF800000> : vector<8xf32>
    %26 = vector.multi_reduction <maximumf>, %25, %cst_14 [1] : vector<8x4xf32> to vector<8xf32>
    %27 = vector.shape_cast %26 : vector<8xf32> to vector<8x1xf32>
    %28 = tpu.iota {dimensions = array<i32: 1>} : vector<8x4xi32>
    %29 = vector.broadcast %27 : vector<8x1xf32> to vector<8x4xf32>
    %30 = arith.cmpf oeq, %25, %29 : vector<8x4xf32>
    %c4_i32_15 = arith.constant 4 : i32
    %31 = vector.broadcast %c4_i32_15 : i32 to vector<8x4xi32>
    %32 = arith.select %30, %28, %31 : vector<8x4xi1>, vector<8x4xi32>
    %cst_16 = arith.constant dense<2147483647> : vector<8xi32>
    %33 = vector.multi_reduction <minsi>, %32, %cst_16 [1] : vector<8x4xi32> to vector<8xi32>
    %34 = vector.shape_cast %33 : vector<8xi32> to vector<8x1xi32>
    %35 = arith.sitofp %34 : vector<8x1xi32> to vector<8x1xf32>
    %36 = vector.extract_strided_slice %13 {offsets = [0, 8], sizes = [8, 6], strides = [1, 1]} : vector<8x14xf32> to vector<8x6xf32>
    %37 = tpu.iota {dimensions = array<i32: 1>} : vector<8x6xi32>
    %c3_i32 = arith.constant 3 : i32
    %38 = vector.broadcast %c3_i32 : i32 to vector<8x6xi32>
    %39 = arith.cmpi slt, %37, %38 : vector<8x6xi32>
    %cst_17 = arith.constant 0.000000e+00 : f32
    %40 = vector.broadcast %cst_17 : f32 to vector<8x6xf32>
    %41 = arith.cmpf ogt, %36, %40 : vector<8x6xf32>
    %42 = arith.extui %41 : vector<8x6xi1> to vector<8x6xi32>
    %43 = arith.sitofp %42 : vector<8x6xi32> to vector<8x6xf32>
    %44 = arith.select %39, %36, %43 : vector<8x6xi1>, vector<8x6xf32>
    %45 = tpu.concatenate %24, %35, %44 in 1 : vector<8x1xf32>, vector<8x1xf32>, vector<8x6xf32> -> vector<8x8xf32>
    %46 = vector.shape_cast %45 : vector<8x8xf32> to vector<1x8x8xf32>
    %c0_18 = arith.constant 0 : index
    %c0_19 = arith.constant 0 : index
    %c0_20 = arith.constant 0 : index
    %47 = vector.load %arg8[%c0_18, %c0_19, %c0_20] : memref<1x8x8xf32, #tpu.memory_space<vmem>>, vector<1x8x8xf32>
    tpu.vector_store %arg8[%c0_18, %c0_19, %c0_20], %46 {strides = array<i32>} : memref<1x8x8xf32, #tpu.memory_space<vmem>>, vector<1x8x8xf32>,
    %cst_21 = arith.constant dense<0x7F800000> : vector<1x8xf32>
    %48 = vector.multi_reduction <minimumf>, %46, %cst_21 [1] : vector<1x8x8xf32> to vector<1x8xf32>
    %49 = vector.shape_cast %48 : vector<1x8xf32> to vector<1x1x8xf32>
    %cst_22 = arith.constant dense<0xFF800000> : vector<1x8xf32>
    %50 = vector.multi_reduction <maximumf>, %46, %cst_22 [1] : vector<1x8x8xf32> to vector<1x8xf32>
    %51 = vector.shape_cast %50 : vector<1x8xf32> to vector<1x1x8xf32>
    %52 = vector.broadcast %49 : vector<1x1x8xf32> to vector<1x8x8xf32>
    %53 = arith.subf %46, %52 : vector<1x8x8xf32>
    %54 = arith.subf %51, %49 : vector<1x1x8xf32>
    %cst_23 = arith.constant 1.000000e-07 : f32
    %55 = vector.broadcast %cst_23 : f32 to vector<1x1x8xf32>
    %56 = arith.addf %54, %55 : vector<1x1x8xf32>
    %57 = vector.broadcast %56 : vector<1x1x8xf32> to vector<1x8x8xf32>
    %58 = arith.divf %53, %57 : vector<1x8x8xf32>
    %59 = vector.shape_cast %58 : vector<1x8x8xf32> to vector<8x8xf32>
    %c0_24 = arith.constant 0 : index
    %c0_25 = arith.constant 0 : index
    %60 = vector.load %arg6[%c0_24, %c0_25] : memref<8x8xf32, #tpu.memory_space<vmem>>, vector<8x8xf32>
    %cst_26 = arith.constant dense<0.000000e+00> : vector<8x8xf32>
    %61 = tpu.matmul %59, %60, %cst_26 {dimension_numbers = #tpu.dot_dimension_numbers<[1], [0], [0], [1], [0, 0, 1, 1], [], []>} : vector<8x8xf32>, vector<8x8xf32>, vector<8x8xf32> -> vector<8x8xf32>
    %c0_27 = arith.constant 0 : index
    %c0_28 = arith.constant 0 : index
    %62 = vector.load %arg7[%c0_27, %c0_28] : memref<1x8xf32, #tpu.memory_space<vmem>>, vector<1x8xf32>
    %63 = vector.broadcast %62 : vector<1x8xf32> to vector<8x8xf32>
    %64 = arith.addf %61, %63 : vector<8x8xf32>
    %65 = vector.shape_cast %64 : vector<8x8xf32> to vector<1x8x8xf32>
    %66 = vector.extract_strided_slice %65 {offsets = [0, 0, 0], sizes = [1, 8, 4], strides = [1, 1, 1]} : vector<1x8x8xf32> to vector<1x8x4xf32>
    %cst_29 = arith.constant dense<0xFF800000> : vector<1x8xf32>
    %67 = vector.multi_reduction <maximumf>, %66, %cst_29 [2] : vector<1x8x4xf32> to vector<1x8xf32>
    %68 = vector.shape_cast %67 : vector<1x8xf32> to vector<1x8x1xf32>
    %69 = vector.broadcast %68 : vector<1x8x1xf32> to vector<1x8x4xf32>
    %70 = arith.subf %66, %69 : vector<1x8x4xf32>
    %71 = math.exp %70 : vector<1x8x4xf32>
    %cst_30 = arith.constant dense<0.000000e+00> : vector<1x8xf32>
    %72 = vector.multi_reduction <add>, %71, %cst_30 [2] : vector<1x8x4xf32> to vector<1x8xf32>
    %73 = vector.shape_cast %72 : vector<1x8xf32> to vector<1x8x1xf32>
    %74 = math.log %73 : vector<1x8x1xf32>
    %75 = arith.addf %68, %74 : vector<1x8x1xf32>
    %76 = arith.subf %75, %68 : vector<1x8x1xf32>
    %cst_31 = arith.constant dense<0.000000e+00> : vector<1x1xf32>
    %77 = vector.multi_reduction <add>, %76, %cst_31 [1] : vector<1x8x1xf32> to vector<1x1xf32>
    %78 = vector.shape_cast %77 : vector<1x1xf32> to vector<1x1x1xf32>
    %cst_32 = arith.constant 8.000000e+00 : f32
    %79 = vector.broadcast %cst_32 : f32 to vector<1x1x1xf32>
    %80 = arith.divf %78, %79 : vector<1x1x1xf32>
    %cst_33 = arith.constant 4.000000e-01 : f32
    %81 = vector.broadcast %cst_33 : f32 to vector<1x1x1xf32>
    %82 = arith.mulf %81, %80 : vector<1x1x1xf32>
    %83 = vector.extract_strided_slice %65 {offsets = [0, 0, 4], sizes = [1, 8, 4], strides = [1, 1, 1]} : vector<1x8x8xf32> to vector<1x8x4xf32>
    %cst_34 = arith.constant dense<0xFF800000> : vector<1x8xf32>
    %84 = vector.multi_reduction <maximumf>, %83, %cst_34 [2] : vector<1x8x4xf32> to vector<1x8xf32>
    %85 = vector.shape_cast %84 : vector<1x8xf32> to vector<1x8x1xf32>
    %86 = vector.broadcast %85 : vector<1x8x1xf32> to vector<1x8x4xf32>
    %87 = arith.subf %83, %86 : vector<1x8x4xf32>
    %88 = math.exp %87 : vector<1x8x4xf32>
    %cst_35 = arith.constant dense<0.000000e+00> : vector<1x8xf32>
    %89 = vector.multi_reduction <add>, %88, %cst_35 [2] : vector<1x8x4xf32> to vector<1x8xf32>
    %90 = vector.shape_cast %89 : vector<1x8xf32> to vector<1x8x1xf32>
    %91 = math.log %90 : vector<1x8x1xf32>
    %92 = arith.addf %85, %91 : vector<1x8x1xf32>
    %93 = arith.subf %92, %85 : vector<1x8x1xf32>
    %cst_36 = arith.constant dense<0.000000e+00> : vector<1x1xf32>
    %94 = vector.multi_reduction <add>, %93, %cst_36 [1] : vector<1x8x1xf32> to vector<1x1xf32>
    %95 = vector.shape_cast %94 : vector<1x1xf32> to vector<1x1x1xf32>
    %cst_37 = arith.constant 8.000000e+00 : f32
    %96 = vector.broadcast %cst_37 : f32 to vector<1x1x1xf32>
    %97 = arith.divf %95, %96 : vector<1x1x1xf32>
    %cst_38 = arith.constant 4.000000e-01 : f32
    %98 = vector.broadcast %cst_38 : f32 to vector<1x1x1xf32>
    %99 = arith.mulf %98, %97 : vector<1x1x1xf32>
    %100 = arith.addf %82, %99 : vector<1x1x1xf32>
    %c0_39 = arith.constant 0 : index
    %c0_40 = arith.constant 0 : index
    %c0_41 = arith.constant 0 : index
    %101 = vector.load %arg9[%c0_39, %c0_40, %c0_41] : memref<1x1x1xf32, #tpu.memory_space<vmem>>, vector<1x1x1xf32>
    tpu.vector_store %arg9[%c0_39, %c0_40, %c0_41], %100 {strides = array<i32>} : memref<1x1x1xf32, #tpu.memory_space<vmem>>, vector<1x1x1xf32>,
    return
  }
  func.func @transform_0(%arg0: i32) -> (i32, i32, i32) {
    %c0_i32 = arith.constant 0 : i32
    %c0_i32_0 = arith.constant 0 : i32
    %c0_i32_1 = arith.constant 0 : i32
    return %arg0, %c0_i32, %c0_i32_0 : i32, i32, i32
  }
  func.func @transform_1(%arg0: i32) -> (i32, i32) {
    %c0_i32 = arith.constant 0 : i32
    %c0_i32_0 = arith.constant 0 : i32
    %c0_i32_1 = arith.constant 0 : i32
    return %c0_i32, %c0_i32_0 : i32, i32
  }
  func.func @transform_2(%arg0: i32) -> (i32, i32) {
    %c0_i32 = arith.constant 0 : i32
    %c0_i32_0 = arith.constant 0 : i32
    %c0_i32_1 = arith.constant 0 : i32
    return %c0_i32, %c0_i32_0 : i32, i32
  }
  func.func @transform_3(%arg0: i32) -> (i32, i32) {
    %c0_i32 = arith.constant 0 : i32
    %c0_i32_0 = arith.constant 0 : i32
    %c0_i32_1 = arith.constant 0 : i32
    return %c0_i32, %c0_i32_0 : i32, i32
  }
  func.func @transform_4(%arg0: i32) -> (i32, i32) {
    %c0_i32 = arith.constant 0 : i32
    %c0_i32_0 = arith.constant 0 : i32
    %c0_i32_1 = arith.constant 0 : i32
    return %c0_i32, %c0_i32_0 : i32, i32
  }
  func.func @transform_5(%arg0: i32) -> (i32, i32) {
    %c0_i32 = arith.constant 0 : i32
    %c0_i32_0 = arith.constant 0 : i32
    %c0_i32_1 = arith.constant 0 : i32
    return %c0_i32, %c0_i32_0 : i32, i32
  }
  func.func @transform_6(%arg0: i32) -> (i32, i32) {
    %c0_i32 = arith.constant 0 : i32
    %c0_i32_0 = arith.constant 0 : i32
    %c0_i32_1 = arith.constant 0 : i32
    return %c0_i32, %c0_i32_0 : i32, i32
  }
  func.func @transform_7(%arg0: i32) -> (i32, i32, i32) {
    %c0_i32 = arith.constant 0 : i32
    %c0_i32_0 = arith.constant 0 : i32
    %c0_i32_1 = arith.constant 0 : i32
    return %arg0, %c0_i32, %c0_i32_0 : i32, i32, i32
  }
  func.func @transform_8(%arg0: i32) -> (i32, i32, i32) {
    %c0_i32 = arith.constant 0 : i32
    %c0_i32_0 = arith.constant 0 : i32
    %c0_i32_1 = arith.constant 0 : i32
    return %arg0, %c0_i32, %c0_i32_0 : i32, i32, i32
  }
}

</mosaic_0001>

<bundles_post_ra>
// kernel: tpu_custom_call.1
= control target key start
LH: loop header
LB: loop body
LE: loop exit
PB: predicated region body
PF: predicated region fallthrough
CT: control target
= control target key end

     0   :  { %14 = vsyncpa [#allocation3], 0  ;;  %v551_v1 = vmov 0.0   ;;  %vm552_vm0 = vmmov 0   ;;  %s666_s0 = inlined_call_operand.vmem [shape: f32[1,8,16], index: 0, kind: input, shape index: {}]   ;;  %s667_s1 = inlined_call_operand.vmem [shape: f32[16,32], index: 1, kind: input, shape index: {}]   ;;  %s668_s2 = inlined_call_operand.vmem [shape: f32[1,32], index: 2, kind: input, shape index: {}]   ;;  %s669_s3 = inlined_call_operand.vmem [shape: f32[32,14], index: 3, kind: input, shape index: {}]   ;;  %s670_s4 = inlined_call_operand.vmem [shape: f32[1,14], index: 4, kind: input, shape index: {}]   ;;  %s671_s5 = inlined_call_operand.vmem [shape: f32[8,8], index: 5, kind: input, shape index: {}]   ;;  %s672_s6 = inlined_call_operand.vmem [shape: f32[1,8], index: 6, kind: input, shape index: {}]   ;;  %s673_s7 = inlined_call_operand.hbm [shape: f32[1,8,8], index: 7, kind: output, shape index: {0}]   ;;  %s674_s8 = inlined_call_operand.hbm [shape: f32[1,1,1], index: 8, kind: output, shape index: {1}]  }
   0x1   :  { %v32_v0 = vld [vmem:[%s667_s1 + $0x8] sm:$0xff]  ;;  %466 = vmatprep.subr.mxu0 %v551_v1  ;;  %v31_v2 = vld [vmem:[%s667_s1] sm:$0xff]  ;;  %470 = vmatprep.mubr.msk.f32.mxu0 %vm552_vm0, %v551_v1  ;;  %v118_v3 = vld [vmem:[%s669_s3 + $0x18] sm:$0xff] }
   0x2   :  { %15 = vsyncpa [#allocation5], 0  ;;  %467 = vmatpush3.msra.mxu0 %v32_v0  ;;  %v30_v4 = vld [vmem:[%s666_s0] sm:$0xff]  ;;  %vm40_vm1 = vcmask 130048   ;;  %473 = vmatprep.subr.mxu1 %v551_v1  ;;  %v117_v5 = vld [vmem:[%s669_s3 + $0x10] sm:$0xff]  ;;  %vm126_vm2 = vcmask 261120   ;;  %v204_v13 = vlaneseq }
   0x3   :  { %468 = vmatprep.subr.mxu0 %v551_v1  ;;  %474 = vmatpush3.msra.mxu1 %v118_v3  ;;  %v116_v6 = vld [vmem:[%s669_s3 + $0x8] sm:$0xff]  ;;  %v115_v7 = vld [vmem:[%s669_s3] sm:$0xff]  ;;  %s553_s19 = smov 4   ;;  %vm200_vm3 = vcmask 31744   ;;  %vm224_vm4 = vcmask 64544   ;;  %s555_s3 = smov 2  }
   0x4   :  { %469 = vmatpush3.msra.mxu0 %v31_v2  ;;  %475 = vmatprep.subr.mxu1 %v551_v1  ;;  %v449_v8 = vld [vmem:[%s668_s2] ss:$0 sm:$0xff]  ;;  %v205_v14 = vand.u32 127, %v204_v13  ;;  %s554_s2 = smov 120   ;;  %vm265_vm11 = vcmask 7168   ;;  %vm267_vm12 = vcmask 15360  }
   0x5   :  { %471 = vmatmul.mubr.msk.f32.vlgmr.msra.gmra.mxu0 %vm40_vm1, %v30_v4  ;;  %481 = vmatprep.mubr.msk.f32.mxu1 %vm552_vm0, %v551_v1  ;;  %v451_v15 = vld [vmem:[%s670_s4] ss:$0 sm:$0xff]  ;;  %vm269_vm13 = vcmask 64512   ;;  %s556_s24 = smov 124  }
   0x6   :  { %484 = vmatprep.subr.mxu0 %v551_v1  ;;  %486 = vmatprep.mubr.msk.f32.mxu0 %vm552_vm0, %v551_v1  ;;  %vm248_vm10 = vcmp.lt.s32.totalorder %v205_v14, 3  ;;  %v290_v44 = vld [vmem:[%s671_s5] sm:$0xff] }
   0x7   :  { %476 = vmatpush3.msra.mxu1 %v117_v5  ;;  %229 = vrot.lane.b32.xlu1 %v205_v14, %s553_s19 }
   0x8   :  { %477 = vmatprep.subr.mxu1 %v551_v1  ;;  %485 = vmatpush3.msra.mxu0 %v290_v44 }
   0x9   :  { %478 = vmatpush3.msra.mxu1 %v116_v6 }
   0xa   :  { %479 = vmatprep.subr.mxu1 %v551_v1 }
   0xb   :  { %480 = vmatpush3.msra.mxu1 %v115_v7 }
  0x79   :  { %v230_v24 = vpop.permute.xlu1 %229 }
  0xc5   :  { %v110_v9 = vpop.f32.mrf.mxu0 }
  0xc6   :  { %v111_v10 = vadd.f32 %v449_v8, %v110_v9 }
  0xc7   :  { %v472_v11 = vpop.f32.mrf.mxu0 }
  0xc8   :  { %v114_v12 = vmax.f32 %v111_v10, 0.0 }
  0xca   :  { %482 = vmatmul.mubr.msk.f32.vlgmr.msra.gmra.mxu1 %vm126_vm2, %v114_v12 }
 0x18a   :  { %v196_v16 = vpop.f32.mrf.mxu1 }
 0x18b   :  { %v197_v17 = vadd.f32 %v451_v15, %v196_v16  ;;  %v454_v15 = vld [vmem:[%s672_s6] ss:$0 sm:$0xff]  ;;  %s557_s6 = smov [#allocation2]  }
 0x18c   :  { %v483_v18 = vpop.f32.mrf.mxu1  ;;  %s427_s25 = sshll.u32 %s557_s6, 4  ;;  %s428_s25 = int_to_ptr.vmem [resolvable:$true] %s427_s25 }
 0x18d   :  { %v201_v19 = vsel %vm200_vm3, %v197_v17, -inf  ;;  %v225_v20 = vsel %vm224_vm4, %v197_v17, -inf  ;;  %vm249_vm7 = vcmp.gt.f32.partialorder %v197_v17, 0.0  ;;  %s507_s26 = scalar_lea.vmem %s428_s25, 128  ;;  %p512_p1 = scmp.lt.s32.totalorder %s428_s25, %s428_s25 }
 0x18e   :  { %202 = vmax.xlane.f32.xlu0 %v201_v19  ;;  %v453_v32 = vsel %vm249_vm7, 1.0, %v551_v1  ;;  %p508_p0 = scmp.ne.s32.totalorder %s428_s25, %s507_s26  ;;  %p513_p2 = scmp.lt.s32.totalorder %s507_s26, %s507_s26 }
 0x190   :  { %p514_p3 = por %p513_p2, %p512_p1 }
 0x192   :  { %226 = vmax.xlane.f32.xlu0 %v225_v20  ;;  %p515_p4 = pnand %p514_p3, %p508_p0 }
 0x217   :  { %v203_v21 = vpop.xlane.xlu0 %202 }
 0x218   :  { %vm206_vm5 = vcmp.eq.f32.partialorder %v197_v17, %v203_v21 }
 0x219   :  { %v207_v22 = vsel %vm206_vm5, %v205_v14, 4 }
 0x21a   :  { %v208_v23 = vsel %vm200_vm3, %v207_v22, 2147483647 }
 0x21b   :  { %v227_v25 = vpop.xlane.xlu0 %226  ;;  %v210_v26 = vshra.s32 %v208_v23, 16  ;;  %v209_v33 = vand.u32 65535, %v208_v23 }
 0x21c   :  { %vm228_vm6 = vcmp.eq.f32.partialorder %v197_v17, %v227_v25 }
 0x21d   :  { %v231_v27 = vsel %vm228_vm6, %v230_v24, 4  ;;  %v212_v28 = vcvt.s32.f32 %v210_v26  ;;  %v211_v36 = vcvt.s32.f32 %v209_v33 }
 0x21e   :  { %v232_v29 = vsel %vm224_vm4, %v231_v27, 2147483647 }
 0x21f   :  { %213 = vmin.xlane.f32.xlu1 %v212_v28  ;;  %v234_v30 = vshra.s32 %v232_v29, 16  ;;  %v233_v34 = vand.u32 65535, %v232_v29 }
 0x221   :  { %v236_v31 = vcvt.s32.f32 %v234_v30  ;;  %v235_v39 = vcvt.s32.f32 %v233_v34 }
 0x223   :  { %237 = vmin.xlane.f32.xlu0 %v236_v31 }
 0x239   :  { %253 = vrot.lane.b32.xlu0 %v197_v17, %s554_s2 }
 0x23d   :  { %257 = vrot.lane.b32.xlu0 %v453_v32, %s554_s2 }
 0x2a8   :  { %v214_v35 = vpop.xlane.xlu1 %213 }
 0x2a9   :  { %vm215_vm8 = vcmp.eq.f32.partialorder %v212_v28, %v214_v35  ;;  %v220_v45 = vcvt.f32.s32 %v214_v35 }
 0x2aa   :  { %v216_v37 = vsel %vm215_vm8, %v211_v36, inf }
 0x2ab   :  { %217 = vmin.xlane.f32.xlu0 %v216_v37  ;;  %v221_v49 = vshll.u32 %v220_v45, 16 }
 0x2ac   :  { %v238_v38 = vpop.xlane.xlu0 %237 }
 0x2ad   :  { %vm239_vm9 = vcmp.eq.f32.partialorder %v236_v31, %v238_v38  ;;  %v244_v47 = vcvt.f32.s32 %v238_v38 }
 0x2ae   :  { %v240_v40 = vsel %vm239_vm9, %v235_v39, inf }
 0x2af   :  { %241 = vmin.xlane.f32.xlu1 %v240_v40  ;;  %v245_v51 = vshll.u32 %v244_v47, 16 }
 0x2b0   :  { %v254_v41 = vpop.permute.xlu0 %253 }
 0x2b4   :  { %v258_v42 = vpop.permute.xlu0 %257 }
 0x2b5   :  { %v260_v43 = vsel %vm248_vm10, %v254_v41, %v258_v42 }
 0x2c0   :  { %262 = vrot.lane.b32.xlu1 %v260_v43, %s555_s3 }
 0x334   :  { %v218_v46 = vpop.xlane.xlu0 %217 }
 0x335   :  { %v219_v48 = vcvt.f32.s32 %v218_v46 }
 0x337   :  { %v222_v52 = vadd.s32 %v221_v49, %v219_v48 }
 0x338   :  { %v242_v50 = vpop.xlane.xlu1 %241 }
 0x339   :  { %v243_v53 = vcvt.f32.s32 %v242_v50  ;;  %v223_v55 = vcvt.s32.f32 %v222_v52 }
 0x33b   :  { %v246_v54 = vadd.s32 %v245_v51, %v243_v53 }
 0x33c   :  { %v263_v58 = vpop.permute.xlu1 %262 }
 0x33d   :  { %v247_v56 = vcvt.s32.f32 %v246_v54 }
 0x33f   :  { %v266_v57 = vsel %vm265_vm11, %v223_v55, %v247_v56 }
 0x340   :  { %v268_v59 = vsel %vm267_vm12, %v266_v57, %v263_v58 }
 0x341   :  { %v271_v60 = vsel %vm269_vm13, %v268_v59, inf  ;;  %v278_v61 = vsel %vm269_vm13, %v268_v59, -inf  ;;  %270 = vst.msk [vmem:[#allocation2] sm:$0xff] %vm269_vm13, %v268_v59 }
 0x342   :  { %v272_v62 = vrot.slane %v271_v60, 4  ;;  %v279_v63 = vrot.slane %v278_v61, 4 }
 0x344   :  { %v273_v0 = vmin.f32 %v271_v60, %v272_v62  ;;  %v280_v1 = vmax.f32 %v278_v61, %v279_v63 }
 0x346   :  { %v274_v2 = vrot.slane %v273_v0, 2  ;;  %v281_v3 = vrot.slane %v280_v1, 2 }
 0x348   :  { %v275_v4 = vmin.f32 %v273_v0, %v274_v2  ;;  %v282_v5 = vmax.f32 %v280_v1, %v281_v3 }
 0x34a   :  { %v276_v6 = vrot.slane %v275_v4, 1  ;;  %v283_v7 = vrot.slane %v282_v5, 1 }
 0x34c   :  { %v277_v8 = vmin.f32 %v275_v4, %v276_v6  ;;  %v284_v9 = vmax.f32 %v282_v5, %v283_v7 }
 0x34e   :  { %v286_v10 = vsub.f32 %v284_v9, %v277_v8  ;;  %v285_v12 = vsub.f32 %v268_v59, %v277_v8 }
 0x350   :  { %v287_v11 = vadd.f32 1e-07, %v286_v10 }
 0x352   :  { %497 = vrcp.f32 %v287_v11 }
 0x35f   :  { %v498_v13 = vpop.eup %497 }
 0x360   :  { %v289_v14 = vmul.f32 %v498_v13, %v285_v12 }
 0x362   :  { %487 = vmatmul.mubr.msk.f32.vlgmr.msra.gmra.mxu0 %vm269_vm13, %v289_v14 }
 0x422   :  { %v367_v16 = vpop.f32.mrf.mxu0 }
 0x423   :  { %v368_v17 = vadd.f32 %v454_v15, %v367_v16 }
 0x424   :  { %v488_v18 = vpop.f32.mrf.mxu0 }
 0x425   :  { %v393_v19 = vsel %vm224_vm4, %v368_v17, -inf  ;;  %v371_v20 = vsel %vm200_vm3, %v368_v17, -inf }
 0x426   :  { %394 = vmax.xlane.f32.xlu1 %v393_v19  ;;  %372 = vmax.xlane.f32.xlu0 %v371_v20 }
 0x4af   :  { %v395_v21 = vpop.xlane.xlu1 %394  ;;  %v373_v25 = vpop.xlane.xlu0 %372 }
 0x4b0   :  { %v396_v22 = vsub.f32 %v368_v17, %v395_v21  ;;  %v374_v26 = vsub.f32 %v368_v17, %v373_v25 }
 0x4b2   :  { %v397_v23 = vmul.f32 1.442695, %v396_v22  ;;  %v375_v27 = vmul.f32 1.442695, %v374_v26 }
 0x4b4   :  { %499 = vpow2.f32 %v397_v23 }
 0x4b5   :  { %501 = vpow2.f32 %v375_v27 }
 0x4c1   :  { %v500_v24 = vpop.eup %499 }
 0x4c2   :  { %400 = vrot.lane.b32.xlu0 %v500_v24, %s556_s24  ;;  %v502_v28 = vpop.eup %501 }
 0x4c3   :  { %v377_v29 = vsel %vm200_vm3, %v502_v28, 0.0 }
 0x4e1   :  { %378 = vadd.xlane.f32.xlu0 %v377_v29 }
 0x534   :  { %v401_v30 = vpop.permute.xlu0 %400 }
 0x535   :  { %v403_v31 = vsel %vm200_vm3, %v401_v30, 0.0 }
 0x536   :  { %404 = vadd.xlane.f32.xlu1 %v403_v31 }
 0x537   :  { %518 = shalt.err (!%p515_p4)
}
 0x538   :  { %430 = dma.vmem_to_hbm [thread:$0]  %s428_s25, 128, %s673_s7, [#allocation3]   ;;  %vm419_vm14 = vcmask 0  }
 0x539   :  { %s558_s7 = smov [#allocation4]  }
 0x53a   :  { %s437_s29 = sshll.u32 %s558_s7, 4  ;;  %s438_s29 = int_to_ptr.vmem [resolvable:$true] %s437_s29 }
 0x53b   :  { %s527_s30 = scalar_lea.vmem %s438_s29, 16  ;;  %s531_s9 = scalar_lea.vmem %s438_s29, 32 }
 0x53c   :  { %p528_p5 = scmp.ne.s32.totalorder %s438_s29, %s527_s30  ;;  %p532_p6 = scmp.lt.s32.totalorder %s438_s29, %s438_s29 }
 0x53d   :  { %p533_p7 = scmp.lt.s32.totalorder %s531_s9, %s527_s30 }
 0x53f   :  { %p534_p8 = por %p533_p7, %p532_p6 }
 0x541   :  { %p535_p9 = pnand %p534_p8, %p528_p5 }
 0x56a   :  { %v379_v32 = vpop.xlane.xlu0 %378 }
 0x56b   :  { %503 = vlog2.f32 %v379_v32 }
 0x578   :  { %v504_v33 = vpop.eup %503 }
 0x579   :  { %v381_v34 = vmul.f32 0.6931472, %v504_v33 }
 0x57b   :  { %v382_v35 = vadd.f32 %v381_v34, %v373_v25 }
 0x57d   :  { %v383_v37 = vsub.f32 %v382_v35, %v373_v25 }
 0x57f   :  { %v384_v38 = vrot.slane %v383_v37, 4 }
 0x581   :  { %v385_v39 = vadd.f32 %v384_v38, %v383_v37 }
 0x583   :  { %v386_v42 = vrot.slane %v385_v39, 2 }
 0x585   :  { %v387_v45 = vadd.f32 %v386_v42, %v385_v39 }
 0x587   :  { %v388_v48 = vrot.slane %v387_v45, 1 }
 0x589   :  { %v389_v50 = vadd.f32 %v388_v48, %v387_v45 }
 0x58b   :  { %v391_v53 = vmul.f32 0.125, %v389_v50 }
 0x58d   :  { %v392_v56 = vmul.f32 0.4, %v391_v53 }
 0x5bf   :  { %v405_v36 = vpop.xlane.xlu1 %404 }
 0x5c0   :  { %505 = vlog2.f32 %v405_v36 }
 0x5cd   :  { %v506_v40 = vpop.eup %505 }
 0x5ce   :  { %v407_v41 = vmul.f32 0.6931472, %v506_v40 }
 0x5d0   :  { %v408_v43 = vadd.f32 %v407_v41, %v395_v21 }
 0x5d2   :  { %v409_v44 = vsub.f32 %v408_v43, %v395_v21 }
 0x5d4   :  { %v410_v46 = vrot.slane %v409_v44, 4 }
 0x5d6   :  { %v411_v47 = vadd.f32 %v410_v46, %v409_v44 }
 0x5d8   :  { %v412_v49 = vrot.slane %v411_v47, 2 }
 0x5da   :  { %v413_v51 = vadd.f32 %v412_v49, %v411_v47 }
 0x5dc   :  { %v414_v52 = vrot.slane %v413_v51, 1 }
 0x5de   :  { %v415_v54 = vadd.f32 %v414_v52, %v413_v51 }
 0x5e0   :  { %v416_v55 = vmul.f32 0.125, %v415_v54 }
 0x5e2   :  { %v417_v57 = vmul.f32 0.4, %v416_v55 }
 0x5e4   :  { %v418_v58 = vadd.f32 %v417_v57, %v392_v56 }
 0x5e6   :  { %420 = vst.msk [vmem:[#allocation4] sm:$0x1] %vm419_vm14, %v418_v58 }
 0x5e7   :  { %538 = shalt.err (!%p535_p9)
}
 0x5e8   :  { %440 = dma.vmem_to_hbm [thread:$0]  %s438_s29, 16, %s674_s8, [#allocation5]  }
 0x5e9   :  { %547 = dma.done.wait [#allocation3], 128  }
 0x5ea   :  { %548 = vsyncadd [#allocation3], 4294967168 }
 0x5eb   :  { %549 = dma.done.wait [#allocation5], 16  }
 0x5ec   :  { %550 = vsyncadd [#allocation5], 4294967280 }
 0x5ed   :  { %447 = vsyncpa [#allocation3], 1 }
 0x5ee   :  { %448 = vsyncpa [#allocation5], 1 }

</bundles_post_ra>
